<compile_context>
chip_gen: v6e
topology: v6e:2x2x1
jax: 0.10.0
libtpu: 0.0.40
codegen_flags: <defaults>
</compile_context>

<pallas_src>
import functools

import jax
import jax.numpy as jnp
from jax import lax
from jax.experimental import pallas as pl
from jax.experimental.pallas import tpu as pltpu


def _round_up(a, b):
    return ((a + b - 1) // b) * b


def _patch_embed_kernel(p_ref, w_ref, b_ref, o_ref):
    # One M-tile: (TM, K_pad) @ (K_pad, N_pad) on the MXU with f32 accumulation,
    # f32 bias add on the VPU, then cast to the output dtype.
    acc = jnp.dot(p_ref[...], w_ref[...], preferred_element_type=jnp.float32)
    o_ref[...] = (acc + b_ref[...]).astype(o_ref.dtype)


def patch_embed_3d(x, weight, bias, patch_size, flatten=True,
                   compute_dtype=jnp.bfloat16):
    """JAX/Pallas equivalent of PatchEmbed3D.forward.

    x:      (B, 1, H, W, D)            float32
    weight: (embed_dim, 1, pH, pW, pD) float32   (Conv3d weight layout)
    bias:   (embed_dim,)               float32
    compute_dtype: dtype used for the MXU operands (bf16 recommended).
    returns (B, num_patches, embed_dim) if flatten else (B, embed_dim, gH, gW, gD)
    """
    B, C, H, W, D = x.shape
    pH, pW, pD = patch_size
    assert C == 1, "PatchEmbed3D uses in_channels=1"
    assert H % pH == 0 and W % pW == 0 and D % pD == 0
    gH, gW, gD = H // pH, W // pW, D // pD
    num_patches = gH * gW * gD
    embed_dim = weight.shape[0]
    K = pH * pW * pD
    M = B * num_patches
    N = embed_dim
    out_dtype = x.dtype

    # Lane-dense padding: last dims multiples of 128.
    K_pad = _round_up(K, 128)
    N_pad = _round_up(N, 128)

    in_bytes = jnp.dtype(compute_dtype).itemsize
    out_bytes = jnp.dtype(out_dtype).itemsize

    # Pick an M tile whose double-buffered working set stays well under the
    # smallest per-generation VMEM budget (~24 MiB headroom, v7x/v5e safe).
    def _need(tm):
        return (2 * tm * K_pad * in_bytes       # P tile, double buffered
                + 2 * K_pad * N_pad * in_bytes  # resident weight (2 buffers)
                + 2 * N_pad * 4                 # bias
                + 2 * tm * N_pad * out_bytes)   # output tile, double buffered

    budget = 24 * 1024 * 1024
    TM = min(512, _round_up(M, 16))
    while TM > 16 and _need(TM) > budget:
        TM = max(16, _round_up(TM // 2, 16))
    M_pad = _round_up(M, TM)
    grid_m = M_pad // TM

    # ---- patchify (pure reshape/transpose) + cast + pad; fused by XLA so the
    #      patch matrix is materialized once, already in compute_dtype. ----
    # TODO(synk): fold the patchify transpose into the kernel via index_map
    # (or allow_input_fusion) to avoid materializing the patch matrix in HBM.
    patches = x.reshape(B, gH, pH, gW, pW, gD, pD)
    patches = patches.transpose(0, 1, 3, 5, 2, 4, 6).reshape(M, K)
    patches = patches.astype(compute_dtype)
    patches = jnp.pad(patches, ((0, M_pad - M), (0, K_pad - K)))

    w_mat = weight.reshape(embed_dim, K).T.astype(compute_dtype)   # (K, N)
    w_mat = jnp.pad(w_mat, ((0, K_pad - K), (0, N_pad - N)))
    b_mat = jnp.pad(bias.astype(jnp.float32).reshape(1, N),
                    ((0, 0), (0, N_pad - N)))

    vmem_limit = int(min(max(2 * _need(TM), 16 * 1024 * 1024),
                         64 * 1024 * 1024))

    cost = pl.CostEstimate(
        flops=2 * M_pad * K_pad * N_pad,
        transcendentals=0,
        bytes_accessed=(M_pad * K_pad * in_bytes
                        + K_pad * N_pad * in_bytes
                        + M_pad * N_pad * out_bytes),
    )

    out = pl.pallas_call(
        _patch_embed_kernel,
        out_shape=jax.ShapeDtypeStruct((M_pad, N_pad), out_dtype),
        grid_spec=pltpu.PrefetchScalarGridSpec(
            num_scalar_prefetch=0,
            grid=(grid_m,),
            in_specs=[
                pl.BlockSpec((TM, K_pad), lambda i: (i, 0)),      # streamed P
                pl.BlockSpec((K_pad, N_pad), lambda i: (0, 0)),   # resident W
                pl.BlockSpec((1, N_pad), lambda i: (0, 0)),       # resident bias
            ],
            out_specs=pl.BlockSpec((TM, N_pad), lambda i: (i, 0)),
        ),
        compiler_params=pltpu.CompilerParams(
            dimension_semantics=("parallel",),
            vmem_limit_bytes=vmem_limit),
        cost_estimate=cost,
    )(patches, w_mat, b_mat)

    out = out[:M, :N].reshape(B, num_patches, embed_dim)  # == flatten(2).T(1,2)
    if not flatten:
        out = out.transpose(0, 2, 1).reshape(B, embed_dim, gH, gW, gD)
    # norm_layer=None -> Identity; nothing to do.
    return out


def _reference_patch_embed(x, weight, bias, patch_size):
    """Pure-JAX reference using lax.conv_general_dilated (matches nn.Conv3d)."""
    out = lax.conv_general_dilated(
        x, weight,
        window_strides=patch_size,
        padding="VALID",
        dimension_numbers=("NCHWD", "OIHWD", "NCHWD"),
    )
    out = out + bias.reshape(1, -1, 1, 1, 1)
    B, E = out.shape[0], out.shape[1]
    return out.reshape(B, E, -1).transpose(0, 2, 1)


if __name__ == "__main__":
    # Small, module-consistent shapes: img_size=16, patch_size=8, embed_dim=32.
    B = 2
    img_size = (16, 16, 16)
    patch_size = (8, 8, 8)
    embed_dim = 32

    key = jax.random.PRNGKey(0)
    k_x, k_w, k_b = jax.random.split(key, 3)

    x = jax.random.normal(k_x, (B, 1) + img_size, dtype=jnp.float32)
    # Conv3d weight layout: (out_ch, in_ch, pH, pW, pD)
    weight = 0.02 * jax.random.normal(
        k_w, (embed_dim, 1) + patch_size, dtype=jnp.float32)
    bias = 0.01 * jax.random.normal(k_b, (embed_dim,), dtype=jnp.float32)

    def _fwd(x, weight, bias, compute_dtype):
        return patch_embed_3d(x, weight, bias, patch_size, flatten=True,
                              compute_dtype=compute_dtype)

    fwd = jax.jit(_fwd, static_argnames=("compute_dtype",))

    ref = jax.block_until_ready(_reference_patch_embed(x, weight, bias, patch_size))

    # Fast bf16-MXU path (default for deployment).
    out_bf16 = jax.block_until_ready(fwd(x, weight, bias,
                                         compute_dtype=jnp.bfloat16))
    assert out_bf16.shape == (B, (16 // 8) ** 3, embed_dim), out_bf16.shape
    assert jnp.allclose(out_bf16, ref, atol=3e-2, rtol=3e-2), (
        float(jnp.max(jnp.abs(out_bf16 - ref))))

    # Full-precision path (exactness check).
    out_f32 = jax.block_until_ready(fwd(x, weight, bias,
                                        compute_dtype=jnp.float32))
    assert jnp.allclose(out_f32, ref, atol=1e-4, rtol=1e-4), (
        float(jnp.max(jnp.abs(out_f32 - ref))))

    print("KERNEL_OK")
</pallas_src>

<mosaic_0001>
module attributes {stable_mosaic.version = 11 : i64} {
  func.func @_patch_embed_kernel(%arg0: i32, %arg1: memref<16x512xbf16, #tpu.memory_space<vmem>>, %arg2: memref<512x128xbf16, #tpu.memory_space<vmem>>, %arg3: memref<1x128xf32, #tpu.memory_space<vmem>>, %arg4: memref<16x128xf32, #tpu.memory_space<vmem>>) attributes {dimension_semantics = [#tpu.dimension_semantics<parallel>], iteration_bounds = array<i64: 1>, scalar_prefetch = 0 : i64, scratch_operands = 0 : i64, tpu.core_type = #tpu.core_type<tc>, window_params = [{transform_indices = @transform_0, window_bounds = array<i64: 16, 512>}, {pipeline_mode = #tpu.pipeline_mode<synchronous>, transform_indices = @transform_1, window_bounds = array<i64: 512, 128>}, {pipeline_mode = #tpu.pipeline_mode<synchronous>, transform_indices = @transform_2, window_bounds = array<i64: 1, 128>}, {transform_indices = @transform_3, window_bounds = array<i64: 16, 128>}]} {
    %c0 = arith.constant 0 : index
    %c0_0 = arith.constant 0 : index
    %0 = vector.load %arg1[%c0, %c0_0] : memref<16x512xbf16, #tpu.memory_space<vmem>>, vector<16x512xbf16>
    %c0_1 = arith.constant 0 : index
    %c0_2 = arith.constant 0 : index
    %1 = vector.load %arg2[%c0_1, %c0_2] : memref<512x128xbf16, #tpu.memory_space<vmem>>, vector<512x128xbf16>
    %cst = arith.constant dense<0.000000e+00> : vector<16x128xf32>
    %2 = tpu.matmul %0, %1, %cst {dimension_numbers = #tpu.dot_dimension_numbers<[1], [0], [0], [1], [0, 0, 1, 1], [], []>} : vector<16x512xbf16>, vector<512x128xbf16>, vector<16x128xf32> -> vector<16x128xf32>
    %c0_3 = arith.constant 0 : index
    %c0_4 = arith.constant 0 : index
    %3 = vector.load %arg3[%c0_3, %c0_4] : memref<1x128xf32, #tpu.memory_space<vmem>>, vector<1x128xf32>
    %4 = vector.broadcast %3 : vector<1x128xf32> to vector<16x128xf32>
    %5 = arith.addf %2, %4 : vector<16x128xf32>
    %c0_5 = arith.constant 0 : index
    %c0_6 = arith.constant 0 : index
    %6 = vector.load %arg4[%c0_5, %c0_6] : memref<16x128xf32, #tpu.memory_space<vmem>>, vector<16x128xf32>
    tpu.vector_store %arg4[%c0_5, %c0_6], %5 {strides = array<i32>} : memref<16x128xf32, #tpu.memory_space<vmem>>, vector<16x128xf32>,
    return
  }
  func.func @transform_0(%arg0: i32) -> (i32, i32) {
    %c0_i32 = arith.constant 0 : i32
    %c0_i32_0 = arith.constant 0 : i32
    return %arg0, %c0_i32 : i32, i32
  }
  func.func @transform_1(%arg0: i32) -> (i32, i32) {
    %c0_i32 = arith.constant 0 : i32
    %c0_i32_0 = arith.constant 0 : i32
    %c0_i32_1 = arith.constant 0 : i32
    return %c0_i32, %c0_i32_0 : i32, i32
  }
  func.func @transform_2(%arg0: i32) -> (i32, i32) {
    %c0_i32 = arith.constant 0 : i32
    %c0_i32_0 = arith.constant 0 : i32
    %c0_i32_1 = arith.constant 0 : i32
    return %c0_i32, %c0_i32_0 : i32, i32
  }
  func.func @transform_3(%arg0: i32) -> (i32, i32) {
    %c0_i32 = arith.constant 0 : i32
    %c0_i32_0 = arith.constant 0 : i32
    return %arg0, %c0_i32 : i32, i32
  }
}

</mosaic_0001>

<bundles_post_ra>
// kernel: _fwd.1
= control target key start
LH: loop header
LB: loop body
LE: loop exit
PB: predicated region body
PF: predicated region fallthrough
CT: control target
= control target key end

     0   :  { %s646_s1 = inlined_call_operand.vmem [shape: bf16[512,128], index: 1, kind: input, shape index: {}]   ;;  %s647_s0 = inlined_call_operand.vmem [shape: bf16[16,512], index: 0, kind: input, shape index: {}]   ;;  %s648_s2 = inlined_call_operand.vmem [shape: f32[1,128], index: 2, kind: input, shape index: {}]   ;;  %s649_s3 = inlined_call_operand.vmem [shape: f32[16,128], index: 3, kind: output, shape index: {}]  }
   0x1   :  { %v471_v0 = vld [vmem:[%s646_s1 + $0x78] sm:$0xff]   ;;  %v475_v4 = vld [vmem:[%s646_s1 + $0x70] sm:$0xff]   ;;  %v479_v8 = vld [vmem:[%s646_s1 + $0x68] sm:$0xff]  }
   0x2   :  { %v472_v1 = vld [vmem:[%s646_s1 + $0xf8] sm:$0xff]   ;;  %427 = vmatprep.subr.bf16.mxu0 %v471_v0  ;;  %v476_v5 = vld [vmem:[%s646_s1 + $0xf0] sm:$0xff]   ;;  %v480_v9 = vld [vmem:[%s646_s1 + $0xe8] sm:$0xff]  }
   0x3   :  { %v473_v2 = vld [vmem:[%s646_s1 + $0x38] sm:$0xff]   ;;  %449 = vmatprep.subr.bf16.mxu1 %v472_v1  ;;  %v477_v6 = vld [vmem:[%s646_s1 + $0x30] sm:$0xff]   ;;  %v481_v10 = vld [vmem:[%s646_s1 + $0x28] sm:$0xff]  }
   0x4   :  { %v474_v3 = vld [vmem:[%s646_s1 + $0xb8] sm:$0xff]   ;;  %428 = vmatpush3.bf16.msra.mxu0 %v473_v2  ;;  %v478_v7 = vld [vmem:[%s646_s1 + $0xb0] sm:$0xff]   ;;  %v482_v11 = vld [vmem:[%s646_s1 + $0xa8] sm:$0xff]  }
   0x5   :  { %450 = vmatpush3.bf16.msra.mxu1 %v474_v3  ;;  %429 = vmatprep.subr.bf16.mxu0 %v475_v4  ;;  %v483_v12 = vld [vmem:[%s646_s1 + $0x60] sm:$0xff]   ;;  %v487_v16 = vld [vmem:[%s646_s1 + $0x58] sm:$0xff]   ;;  %v491_v20 = vld [vmem:[%s646_s1 + $0x50] sm:$0xff]  }
   0x6   :  { %451 = vmatprep.subr.bf16.mxu1 %v476_v5  ;;  %v484_v13 = vld [vmem:[%s646_s1 + $0xe0] sm:$0xff]   ;;  %v488_v17 = vld [vmem:[%s646_s1 + $0xd8] sm:$0xff]   ;;  %v492_v21 = vld [vmem:[%s646_s1 + $0xd0] sm:$0xff]  }
   0x7   :  { %v485_v14 = vld [vmem:[%s646_s1 + $0x20] sm:$0xff]   ;;  %v489_v18 = vld [vmem:[%s646_s1 + $0x18] sm:$0xff]   ;;  %v493_v22 = vld [vmem:[%s646_s1 + $0x10] sm:$0xff]  }
   0x8   :  { %430 = vmatpush3.bf16.msra.mxu0 %v477_v6  ;;  %v486_v15 = vld [vmem:[%s646_s1 + $0xa0] sm:$0xff]   ;;  %v490_v19 = vld [vmem:[%s646_s1 + $0x98] sm:$0xff]   ;;  %v494_v23 = vld [vmem:[%s646_s1 + $0x90] sm:$0xff]  }
   0x9   :  { %452 = vmatpush3.bf16.msra.mxu1 %v478_v7  ;;  %431 = vmatprep.subr.bf16.mxu0 %v479_v8  ;;  %v495_v24 = vld [vmem:[%s646_s1 + $0x48] sm:$0xff]   ;;  %v499_v28 = vld [vmem:[%s646_s1 + $0x40] sm:$0xff]  }
   0xa   :  { %453 = vmatprep.subr.bf16.mxu1 %v480_v9  ;;  %v496_v25 = vld [vmem:[%s646_s1 + $0xc8] sm:$0xff]   ;;  %v500_v29 = vld [vmem:[%s646_s1 + $0xc0] sm:$0xff]  }
   0xb   :  { %v497_v26 = vld [vmem:[%s646_s1 + $0x8] sm:$0xff]   ;;  %v501_v30 = vld [vmem:[%s646_s1] sm:$0xff]  }
   0xc   :  { %432 = vmatpush3.bf16.msra.mxu0 %v481_v10  ;;  %v498_v27 = vld [vmem:[%s646_s1 + $0x88] sm:$0xff]   ;;  %v502_v31 = vld [vmem:[%s646_s1 + $0x80] sm:$0xff]  }
   0xd   :  { %454 = vmatpush3.bf16.msra.mxu1 %v482_v11  ;;  %433 = vmatprep.subr.bf16.mxu0 %v483_v12  ;;  %v503_v32 = vld [vmem:[%s647_s0] ss:$16 sps:$4 sm:$0xff]   ;;  %v505_v33 = vld [vmem:[%s647_s0 + $0x4] ss:$16 sps:$4 sm:$0xff]   ;;  %v506_v34 = vld [vmem:[%s647_s0 + $0x8] ss:$16 sps:$4 sm:$0xff]  }
   0xe   :  { %455 = vmatprep.subr.bf16.mxu1 %v484_v13  ;;  %v508_v35 = vld [vmem:[%s647_s0 + $0xc] ss:$16 sps:$4 sm:$0xff]   ;;  %334 = vmatprep.mubr.bf16.mxu0 %v505_v33  ;;  %v390_v38 = vld [vmem:[%s648_s2] ss:$0 sm:$0xff] }
   0xf   :  { %375 = vmatprep.mubr.bf16.mxu1 %v508_v35 }
  0x10   :  { %434 = vmatpush3.bf16.msra.mxu0 %v485_v14 }
  0x11   :  { %456 = vmatpush3.bf16.msra.mxu1 %v486_v15  ;;  %435 = vmatprep.subr.bf16.mxu0 %v487_v16 }
  0x12   :  { %457 = vmatprep.subr.bf16.mxu1 %v488_v17 }
  0x14   :  { %436 = vmatpush3.bf16.msra.mxu0 %v489_v18 }
  0x15   :  { %458 = vmatpush3.bf16.msra.mxu1 %v490_v19  ;;  %437 = vmatprep.subr.bf16.mxu0 %v491_v20 }
  0x16   :  { %459 = vmatprep.subr.bf16.mxu1 %v492_v21 }
  0x18   :  { %438 = vmatpush3.bf16.msra.mxu0 %v493_v22 }
  0x19   :  { %460 = vmatpush3.bf16.msra.mxu1 %v494_v23  ;;  %439 = vmatprep.subr.bf16.mxu0 %v495_v24 }
  0x1a   :  { %461 = vmatprep.subr.bf16.mxu1 %v496_v25 }
  0x1c   :  { %440 = vmatpush3.bf16.msra.mxu0 %v497_v26 }
  0x1d   :  { %462 = vmatpush3.bf16.msra.mxu1 %v498_v27  ;;  %441 = vmatprep.subr.bf16.mxu0 %v499_v28 }
  0x1e   :  { %463 = vmatprep.subr.bf16.mxu1 %v500_v29 }
  0x20   :  { %442 = vmatpush3.bf16.msra.mxu0 %v501_v30 }
  0x21   :  { %464 = vmatpush3.bf16.msra.mxu1 %v502_v31 }
  0x23   :  { %335 = vmatmul.mubr.bf16.vlgmr.msra.gmra.mxu0 %v503_v32 }
  0x24   :  { %376 = vmatmul.mubr.bf16.vlgmr.msra.gmra.mxu1 %v506_v34 }
  0xe3   :  { %v443_v36 = vpop.f32.mrf.mxu0 }
  0xe4   :  { %v465_v37 = vpop.f32.mrf.mxu1 }
  0xe5   :  { %v444_v39 = vpop.f32.mrf.mxu0 }
  0xe6   :  { %v445_v40 = vadd.f32 %v444_v39, %v443_v36  ;;  %v466_v41 = vpop.f32.mrf.mxu1 }
  0xe7   :  { %v446_v42 = vpop.f32.mrf.mxu0  ;;  %v467_v44 = vadd.f32 %v466_v41, %v465_v37 }
  0xe8   :  { %v337_v43 = vadd.f32 %v445_v40, %v390_v38  ;;  %v468_v45 = vpop.f32.mrf.mxu1 }
  0xe9   :  { %v447_v46 = vpop.f32.mrf.mxu0 }
  0xea   :  { %v378_v47 = vadd.f32 %v467_v44, %v337_v43  ;;  %v448_v48 = vadd.f32 %v447_v46, %v446_v42  ;;  %v469_v49 = vpop.f32.mrf.mxu1 }
  0xeb   :  { %v470_v51 = vadd.f32 %v469_v49, %v468_v45 }
  0xec   :  { %384 = vst [vmem:[%s649_s3] sm:$0xff] %v378_v47  ;;  %v340_v50 = vadd.f32 %v448_v48, %v390_v38 }
  0xee   :  { %v381_v52 = vadd.f32 %v470_v51, %v340_v50 }
  0xf0   :  { %385 = vst [vmem:[%s649_s3 + $0x8] sm:$0xff] %v381_v52 }

</bundles_post_ra>
